<compile_context>
chip_gen: v7x
topology: tpu7x:2x2x1
jax: 0.10.0
libtpu: 0.0.40
codegen_flags: <defaults>
</compile_context>

<pallas_src>
import jax
import jax.numpy as jnp
from jax.experimental import pallas as pl
from jax.experimental.pallas import tpu as pltpu


def cnn_kernel(x_ref, w_ref, b_ref, o_ref):
    """Fused Conv1d(valid) + bias + ReLU + max-over-time for one batch tile.

    x_ref: (L*Cin, TB)         bf16  transposed input, words on lanes
    w_ref: (L_out*Cout, L*Cin) bf16  Toeplitz-expanded conv weight
    b_ref: (Cout, 1)           f32   bias
    o_ref: (Cout, TB)          f32   max-over-time output (transposed layout)
    """
    cout = o_ref.shape[0]
    l_out = w_ref.shape[0] // cout

    # Single lane-dense MXU matmul with f32 accumulation:
    #   (L_out*Cout, L*Cin) x (L*Cin, TB) -> (L_out*Cout, TB)
    acc = jnp.dot(w_ref[...], x_ref[...], preferred_element_type=jnp.float32)

    # Max over time: pairwise-tree max over the L_out row groups.  Each group
    # is Cout sublane rows (8-aligned for Cout=8) -> pure elementwise VPU maxes.
    groups = [acc[t * cout:(t + 1) * cout, :] for t in range(l_out)]
    while len(groups) > 1:
        nxt = [jnp.maximum(a, b) for a, b in zip(groups[0::2], groups[1::2])]
        if len(groups) % 2:
            nxt.append(groups[-1])
        groups = nxt
    m = groups[0]

    # Bias + ReLU after the max (ReLU monotone, bias time-invariant).
    o_ref[...] = jnp.maximum(m + b_ref[...], 0.0).astype(o_ref.dtype)


def cnn_forward(x_ncl, weight, bias, *, block_b=None, compute_dtype=jnp.bfloat16):
    """x_ncl: (B, C_in, L) PyTorch-style input.
    weight: (C_out, C_in, K) PyTorch Conv1d weight.  bias: (C_out,)."""
    B, Cin, L = x_ncl.shape
    Cout, _, K = weight.shape
    if L < K:
        raise ValueError(f"sequence length L={L} must be >= kernel_size K={K}")
    L_out = L - K + 1
    LCin = L * Cin

    # --- batch (word) tiling: words live on the lane axis ---------------------
    if block_b is None:
        block_b = 1024                                   # sweep 512-1024; tiny VMEM use
    block_b = max(128, (block_b // 128) * 128)           # lane-dense tiles
    block_b = min(block_b, pl.cdiv(B, 128) * 128)        # don't over-pad small B
    if B > 128:
        # keep at least 2 grid steps so both v7x TensorCores get work
        block_b = min(block_b, max(128, pl.cdiv(pl.cdiv(B, 2), 128) * 128))
    B_pad = pl.cdiv(B, block_b) * block_b
    nb = B_pad // block_b

    # --- lane-dense transposed input: row l*Cin+ci, lane b --------------------
    x_t = jnp.transpose(x_ncl, (2, 1, 0)).reshape(LCin, B).astype(compute_dtype)
    if B_pad != B:
        x_t = jnp.pad(x_t, ((0, 0), (0, B_pad - B)))

    # --- Toeplitz-expanded weight: W[t*Cout+c, l*Cin+ci] = weight[c, ci, l-t] --
    w_kc = jnp.transpose(weight, (0, 2, 1))              # (Cout, K, Cin)
    rows = [jnp.pad(w_kc, ((0, 0), (t, L - K - t), (0, 0))).reshape(Cout, LCin)
            for t in range(L_out)]
    w_toep = jnp.stack(rows, axis=0).reshape(L_out * Cout, LCin).astype(compute_dtype)

    b2 = bias.astype(jnp.float32).reshape(Cout, 1)

    out_t = pl.pallas_call(
        cnn_kernel,
        out_shape=jax.ShapeDtypeStruct((Cout, B_pad), jnp.float32),
        grid=(nb,),
        in_specs=[
            pl.BlockSpec((LCin, block_b), lambda i: (0, i)),
            pl.BlockSpec((L_out * Cout, LCin), lambda i: (0, 0)),
            pl.BlockSpec((Cout, 1), lambda i: (0, 0)),
        ],
        out_specs=pl.BlockSpec((Cout, block_b), lambda i: (0, i)),
        compiler_params=pltpu.CompilerParams(
            dimension_semantics=("parallel",)),
    )(x_t, w_toep, b2)

    return jnp.transpose(out_t[:, :B]).astype(x_ncl.dtype)


def cnn_reference(x_ncl, weight, bias):
    """Pure-JAX reference (matches PyTorch semantics)."""
    y = jax.lax.conv_general_dilated(
        x_ncl, weight, window_strides=(1,), padding="VALID",
        dimension_numbers=("NCH", "OIH", "NCH"))
    y = y + bias[None, :, None]
    return jnp.max(jax.nn.relu(y), axis=2)


if __name__ == "__main__":
    # Small shapes consistent with the module: B flattened words
    # (e.g. 16 sentences x 16 words), char_embed=4 in-channels,
    # word_embed=8 out-channels, kernel_size=5, max word length L=16.
    B = 256
    char_embed = 4
    word_embed = 8
    K = 5
    L = 16

    key = jax.random.PRNGKey(0)
    kx, kw, kb = jax.random.split(key, 3)

    x = jax.random.normal(kx, (B, char_embed, L), dtype=jnp.float32)
    weight = 0.1 * jax.random.normal(kw, (word_embed, char_embed, K), dtype=jnp.float32)
    bias = 0.1 * jax.random.normal(kb, (word_embed,), dtype=jnp.float32)

    # Default tiling: block_b clamps to 128 here -> grid=(2,), exercising the
    # pipelined multi-step "parallel" grid path.
    out = cnn_forward(x, weight, bias)
    out = jax.block_until_ready(out)
    assert out.shape == (B, word_embed)

    # Tight check vs a reference that sees the same bf16-rounded MXU operands
    # (kernel uses bf16 inputs/weights with f32 accumulation, f32 bias).
    ref_q = cnn_reference(
        x.astype(jnp.bfloat16).astype(jnp.float32),
        weight.astype(jnp.bfloat16).astype(jnp.float32), bias)
    assert jnp.allclose(out, ref_q, atol=1e-4, rtol=1e-4), "mismatch vs bf16-operand reference"

    # Loose check vs the full-f32 PyTorch-semantics reference.
    ref = cnn_reference(x, weight, bias)
    assert jnp.allclose(out, ref, atol=5e-2, rtol=5e-2), "mismatch vs f32 reference"

    print("KERNEL_OK")
</pallas_src>

<mosaic_0001>
module attributes {stable_mosaic.version = 11 : i64} {
  func.func @cnn_kernel(%arg0: i32, %arg1: memref<64x128xbf16, #tpu.memory_space<vmem>>, %arg2: memref<96x64xbf16, #tpu.memory_space<vmem>>, %arg3: memref<8x1xf32, #tpu.memory_space<vmem>>, %arg4: memref<8x128xf32, #tpu.memory_space<vmem>>) attributes {dimension_semantics = [#tpu.dimension_semantics<parallel>], iteration_bounds = array<i64: 2>, scalar_prefetch = 0 : i64, scratch_operands = 0 : i64, tpu.core_type = #tpu.core_type<tc>, window_params = [{transform_indices = @transform_0, window_bounds = array<i64: 64, 128>}, {pipeline_mode = #tpu.pipeline_mode<synchronous>, transform_indices = @transform_1, window_bounds = array<i64: 96, 64>}, {pipeline_mode = #tpu.pipeline_mode<synchronous>, transform_indices = @transform_2, window_bounds = array<i64: 8, 1>}, {transform_indices = @transform_3, window_bounds = array<i64: 8, 128>}]} {
    %c0 = arith.constant 0 : index
    %c0_0 = arith.constant 0 : index
    %0 = vector.load %arg2[%c0, %c0_0] : memref<96x64xbf16, #tpu.memory_space<vmem>>, vector<96x64xbf16>
    %c0_1 = arith.constant 0 : index
    %c0_2 = arith.constant 0 : index
    %1 = vector.load %arg1[%c0_1, %c0_2] : memref<64x128xbf16, #tpu.memory_space<vmem>>, vector<64x128xbf16>
    %cst = arith.constant dense<0.000000e+00> : vector<96x128xf32>
    %2 = tpu.matmul %0, %1, %cst {dimension_numbers = #tpu.dot_dimension_numbers<[1], [0], [0], [1], [0, 0, 1, 1], [], []>} : vector<96x64xbf16>, vector<64x128xbf16>, vector<96x128xf32> -> vector<96x128xf32>
    %3 = vector.extract_strided_slice %2 {offsets = [0, 0], sizes = [8, 128], strides = [1, 1]} : vector<96x128xf32> to vector<8x128xf32>
    %4 = vector.extract_strided_slice %2 {offsets = [8, 0], sizes = [8, 128], strides = [1, 1]} : vector<96x128xf32> to vector<8x128xf32>
    %5 = vector.extract_strided_slice %2 {offsets = [16, 0], sizes = [8, 128], strides = [1, 1]} : vector<96x128xf32> to vector<8x128xf32>
    %6 = vector.extract_strided_slice %2 {offsets = [24, 0], sizes = [8, 128], strides = [1, 1]} : vector<96x128xf32> to vector<8x128xf32>
    %7 = vector.extract_strided_slice %2 {offsets = [32, 0], sizes = [8, 128], strides = [1, 1]} : vector<96x128xf32> to vector<8x128xf32>
    %8 = vector.extract_strided_slice %2 {offsets = [40, 0], sizes = [8, 128], strides = [1, 1]} : vector<96x128xf32> to vector<8x128xf32>
    %9 = vector.extract_strided_slice %2 {offsets = [48, 0], sizes = [8, 128], strides = [1, 1]} : vector<96x128xf32> to vector<8x128xf32>
    %10 = vector.extract_strided_slice %2 {offsets = [56, 0], sizes = [8, 128], strides = [1, 1]} : vector<96x128xf32> to vector<8x128xf32>
    %11 = vector.extract_strided_slice %2 {offsets = [64, 0], sizes = [8, 128], strides = [1, 1]} : vector<96x128xf32> to vector<8x128xf32>
    %12 = vector.extract_strided_slice %2 {offsets = [72, 0], sizes = [8, 128], strides = [1, 1]} : vector<96x128xf32> to vector<8x128xf32>
    %13 = vector.extract_strided_slice %2 {offsets = [80, 0], sizes = [8, 128], strides = [1, 1]} : vector<96x128xf32> to vector<8x128xf32>
    %14 = vector.extract_strided_slice %2 {offsets = [88, 0], sizes = [8, 128], strides = [1, 1]} : vector<96x128xf32> to vector<8x128xf32>
    %15 = arith.maximumf %3, %4 : vector<8x128xf32>
    %16 = arith.maximumf %5, %6 : vector<8x128xf32>
    %17 = arith.maximumf %7, %8 : vector<8x128xf32>
    %18 = arith.maximumf %9, %10 : vector<8x128xf32>
    %19 = arith.maximumf %11, %12 : vector<8x128xf32>
    %20 = arith.maximumf %13, %14 : vector<8x128xf32>
    %21 = arith.maximumf %15, %16 : vector<8x128xf32>
    %22 = arith.maximumf %17, %18 : vector<8x128xf32>
    %23 = arith.maximumf %19, %20 : vector<8x128xf32>
    %24 = arith.maximumf %21, %22 : vector<8x128xf32>
    %25 = arith.maximumf %24, %23 : vector<8x128xf32>
    %c0_3 = arith.constant 0 : index
    %c0_4 = arith.constant 0 : index
    %26 = vector.load %arg3[%c0_3, %c0_4] : memref<8x1xf32, #tpu.memory_space<vmem>>, vector<8x1xf32>
    %27 = vector.broadcast %26 : vector<8x1xf32> to vector<8x128xf32>
    %28 = arith.addf %25, %27 : vector<8x128xf32>
    %cst_5 = arith.constant 0.000000e+00 : f32
    %29 = vector.broadcast %cst_5 : f32 to vector<8x128xf32>
    %30 = arith.maximumf %28, %29 : vector<8x128xf32>
    %c0_6 = arith.constant 0 : index
    %c0_7 = arith.constant 0 : index
    %31 = vector.load %arg4[%c0_6, %c0_7] : memref<8x128xf32, #tpu.memory_space<vmem>>, vector<8x128xf32>
    tpu.vector_store %arg4[%c0_6, %c0_7], %30 {strides = array<i32>} : memref<8x128xf32, #tpu.memory_space<vmem>>, vector<8x128xf32>,
    return
  }
  func.func @transform_0(%arg0: i32) -> (i32, i32) {
    %c0_i32 = arith.constant 0 : i32
    %c0_i32_0 = arith.constant 0 : i32
    return %c0_i32, %arg0 : i32, i32
  }
  func.func @transform_1(%arg0: i32) -> (i32, i32) {
    %c0_i32 = arith.constant 0 : i32
    %c0_i32_0 = arith.constant 0 : i32
    %c0_i32_1 = arith.constant 0 : i32
    return %c0_i32, %c0_i32_0 : i32, i32
  }
  func.func @transform_2(%arg0: i32) -> (i32, i32) {
    %c0_i32 = arith.constant 0 : i32
    %c0_i32_0 = arith.constant 0 : i32
    %c0_i32_1 = arith.constant 0 : i32
    return %c0_i32, %c0_i32_0 : i32, i32
  }
  func.func @transform_3(%arg0: i32) -> (i32, i32) {
    %c0_i32 = arith.constant 0 : i32
    %c0_i32_0 = arith.constant 0 : i32
    return %c0_i32, %arg0 : i32, i32
  }
}

</mosaic_0001>

<bundles_post_ra>
// kernel: tpu_custom_call.1
= control target key start
LH: loop header
LB: loop body
LE: loop exit
PB: predicated region body
PF: predicated region fallthrough
CT: control target
= control target key end

     0   :  { %8 = vsyncpa [#allocation4], 0  ;;  %s852_s0 = inlined_call_operand.vmem [shape: bf16[64,256], index: 0, kind: input, shape index: {}]   ;;  %s853_s1 = inlined_call_operand.vmem [shape: bf16[96,64], index: 1, kind: input, shape index: {}]   ;;  %s854_s2 = inlined_call_operand.vmem [shape: f32[8,1], index: 2, kind: input, shape index: {}]   ;;  %s855_s3 = inlined_call_operand.hbm [shape: f32[8,256], index: 3, kind: output, shape index: {}]  }
   0x1   :  { %10 = vsyncpa [#allocation4 + $0x1], 0  ;;  %s715_s12 = smov 0   ;;  %s717_s13 = smov 0  }
   0x2   :  { %s719_s14 = smov 0   ;;  %s721_s15 = smov 0  }
   0x3 LB: > { %s511_s16 = sadd.s32 4294967295, %s691_s15   ;;  %s512_s17 = sadd.s32 4294967294, %s691_s15   ;;  %s691_s15 = sphi %s721_s15, %s861_s15   ;;  %s687_s14 = sphi %s719_s14, %s860_s14   ;;  %s683_s13 = sphi %s717_s13, %s859_s13   ;;  %s679_s12 = sphi %s715_s12, %s858_s12  }
   0x4   : > { %s738_s18 = sadd.s32 1, %s691_s15   ;;  %s23_s19 = sadd.s32 1, %s687_s14 }
   0x5   : > { %s20_s20 = ssub.s32 %s691_s15, %s738_s18  ;;  %p30_p0 = scmp.ne.s32.totalorder %s687_s14, %s683_s13 }
   0x6   : > { %p21_p1 = scmp.eq.s32.totalorder %s20_s20, 0  ;;  %p31_p2 = scmp.eq.s32.totalorder %s691_s15, 0 }
   0x7   : > { %p102_p3 = scmp.eq.s32.totalorder %s511_s16, 1  ;;  %p107_p4 = scmp.ne.s32.totalorder %s683_s13, %s679_s12 }
   0x8   : > { %s751_s21 = scalar_select %p21_p1, %s687_s14, %s23_s19  }
   0x9   : > { %p32_p5 = por %p31_p2, %p30_p0  ;;  %p753_p6 = por %p102_p3, %p30_p0 }
   0xa   : > { %p108_p7 = scmp.eq.s32.totalorder %s512_s17, 1  ;;  %p514_p9 = scmp.ge.s32.totalorder %s691_s15, 2 }
   0xc   : > { %p757_p8 = por %p108_p7, %p107_p4  ;;  %130 = sbr.rel (%p514_p9) target bundleno = 28 (0x1c), region = 24 }
  0x13   : > { %133 = sbr.rel (!%p32_p5) target bundleno = 28 (0x1c), region = 28  ;;  %s135_s24 = sand.u32 (%p32_p5), 1, %s687_s14  }
  0x14   : > { %s516_s25 = sshll.u32 (%p32_p5), %s691_s15, 2  ;;  %s515_s26 = sshll.u32 (%p32_p5), %s135_s24, 5 }
  0x15   : > { %s139_s29 = scalar_lea.vmem (%p32_p5), %s852_s0, %s516_s25  ;;  %s137_s30 = scalar_lea.vmem (%p32_p5), [#allocation2], %s515_s26 }
  0x16   : > { %v155_v0 = vld [vmem:[%s139_s29] sm:$0xf] (%p32_p5)  ;;  %v157_v1 = vld [vmem:[%s139_s29 + $0x8] sm:$0xf] (%p32_p5)  ;;  %v159_v2 = vld [vmem:[%s139_s29 + $0x10] sm:$0xf] (%p32_p5) }
  0x17   : > { %156 = vst [vmem:[%s137_s30] sm:$0xf] (%p32_p5), %v155_v0  ;;  %158 = vst [vmem:[%s137_s30 + $0x4] sm:$0xf] (%p32_p5), %v157_v1  ;;  %v161_v3 = vld [vmem:[%s139_s29 + $0x18] sm:$0xf] (%p32_p5) }
  0x18   : > { %v163_v4 = vld [vmem:[%s139_s29 + $0x20] sm:$0xf] (%p32_p5)  ;;  %160 = vst [vmem:[%s137_s30 + $0x8] sm:$0xf] (%p32_p5), %v159_v2  ;;  %162 = vst [vmem:[%s137_s30 + $0xc] sm:$0xf] (%p32_p5), %v161_v3 }
  0x19   : > { %164 = vst [vmem:[%s137_s30 + $0x10] sm:$0xf] (%p32_p5), %v163_v4  ;;  %v165_v5 = vld [vmem:[%s139_s29 + $0x28] sm:$0xf] (%p32_p5)  ;;  %v167_v6 = vld [vmem:[%s139_s29 + $0x30] sm:$0xf] (%p32_p5) }
  0x1a   : > { %v169_v7 = vld [vmem:[%s139_s29 + $0x38] sm:$0xf]  ;;  %166 = vst [vmem:[%s137_s30 + $0x14] sm:$0xf] %v165_v5  ;;  %168 = vst [vmem:[%s137_s30 + $0x18] sm:$0xf] %v167_v6 }
  0x1b   : > { %170 = vst [vmem:[%s137_s30 + $0x1c] sm:$0xf] %v169_v7 }
  0x1c PF: > { %p517_p10 = scmp.ge.s32.totalorder %s691_s15, 1  ;;  %p208_p11 = scmp.lt.s32.totalorder %s691_s15, 3 }
  0x1e   : > { %p209_p12 = pnand %p517_p10, %p208_p11 }
  0x1f   : > { %s772_s4 = sand.u32 (!%p209_p12), 1, %s683_s13   ;;  %v623_v8 = vld [vmem:[%s853_s1] sm:$0xff] (!%p209_p12)   ;;  %vm313_vm0 = vcmask (!%p209_p12), 523264   ;;  %v624_v9 = vld [vmem:[%s853_s1 + $0x10] sm:$0xff] (!%p209_p12)   ;;  %v693_v12 = vmov (!%p209_p12), 0   ;;  %v625_v16 = vld [vmem:[%s853_s1 + $0x8] sm:$0xff] (!%p209_p12)  }
  0x20   : > { %212 = sbr.rel (%p209_p12) target bundleno = 298 (0x12a), region = 69  ;;  %s518_s7 = sshll.u32 (!%p209_p12), %s772_s4, 5  ;;  %558 = vmatprep.mubr.msk.bf16.mxu0 (!%p209_p12), %vm313_vm0, %v623_v8  ;;  %562 = vmatprep.mubr.msk.bf16.mxu1 (!%p209_p12), %vm313_vm0, %v624_v9  ;;  %v424_v14 = vld [vmem:[%s854_s2] sm:$0xff] (!%p209_p12)  ;;  %v626_v17 = vld [vmem:[%s853_s1 + $0x18] sm:$0xff] (!%p209_p12)   ;;  %v628_v19 = vld [vmem:[%s853_s1 + $0x28] sm:$0xff] (!%p209_p12)  }
  0x21   : > { %s217_s10 = scalar_lea.vmem (!%p209_p12), [#allocation2], %s518_s7  ;;  %618 = vset.pattern.permute.xlu0 (!%p209_p12), %v693_v12  ;;  %v627_v18 = vld [vmem:[%s853_s1 + $0x20] sm:$0xff] (!%p209_p12)   ;;  %s519_s30 = sshll.u32 (!%p209_p12), %s772_s4, 3 }
  0x22   : > { %v619_v10 = vld [vmem:[%s217_s10] sm:$0xff] (!%p209_p12)   ;;  %v620_v11 = vld [vmem:[%s217_s10 + $0x8] sm:$0xff] (!%p209_p12)   ;;  %v621_v13 = vld [vmem:[%s217_s10 + $0x10] sm:$0xff] (!%p209_p12)   ;;  %427 = vperm.xlu0 (!%p209_p12), %618, %v424_v14   ;;  %s537_s5 = sshll.u32 (!%p209_p12), %s511_s16, 7  ;;  %s237_s6 = scalar_lea.vmem (!%p209_p12), [#allocation3], %s519_s30 }
  0x23   : > { %550 = vmatprep.subr.bf16.mxu0 (!%p209_p12), %v619_v10  ;;  %570 = vmatprep.subr.bf16.mxu1 (!%p209_p12), %v619_v10  ;;  %v622_v15 = vld [vmem:[%s217_s10 + $0x18] sm:$0xff] (!%p209_p12)   ;;  %s447_s7 = sshll.u32 (!%p209_p12), %s237_s6, 4  ;;  %s808_s10 = scalar_lea.hbm (!%p209_p12), %s855_s3, %s537_s5  ;;  %s810_s7 = int_to_ptr.vmem [resolvable:$true] %s447_s7 }
  0x24   : > { %551 = vmatpush3.bf16.msra.mxu0 (!%p209_p12), %v619_v10  ;;  %574 = vmatpush3.bf16.msra.mxu1 (!%p209_p12), %v619_v10  ;;  %s434_s11 = scalar_lea.sflag (!%p209_p12), [#allocation4], %s772_s4  ;;  %s629_s17 = scalar_lea.vmem (!%p209_p12), %s810_s7, 128 }
  0x25   : > { %552 = vmatprep.subr.bf16.mxu0 (!%p209_p12), %v620_v11  ;;  %571 = vmatprep.subr.bf16.mxu1 (!%p209_p12), %v620_v11  ;;  %p630_p13 = scmp.ne.s32.totalorder (!%p209_p12), %s810_s7, %s629_s17  ;;  %s694_s16 = smov (!%p209_p12), [#allocation3]  }
  0x26   : > { %s633_s19 = sshll.u32 (!%p209_p12), %s694_s16, 4  ;;  %s634_s19 = int_to_ptr.vmem [resolvable:$false] %s633_s19 }
  0x27   : > { %p631_p0 = pnand %p630_p13, %p753_p6  ;;  %s635_s20 = scalar_lea.vmem %s634_s19, 256 }
  0x28   : > { %553 = vmatpush3.bf16.msra.mxu0 %v620_v11  ;;  %575 = vmatpush3.bf16.msra.mxu1 %v620_v11  ;;  %p636_p2 = scmp.lt.s32.totalorder %s810_s7, %s634_s19  ;;  %p637_p3 = scmp.lt.s32.totalorder %s635_s20, %s629_s17 }
  0x29   : > { %554 = vmatprep.subr.bf16.mxu0 %v621_v13  ;;  %572 = vmatprep.subr.bf16.mxu1 %v621_v13  ;;  %p632_p1 = pneg %p631_p0 }
  0x2a   : > { %p638_p4 = por %p637_p3, %p636_p2 }
  0x2c   : > { %555 = vmatpush3.bf16.msra.mxu0 %v621_v13  ;;  %576 = vmatpush3.bf16.msra.mxu1 %v621_v13  ;;  %p639_p5 = pnand %p638_p4, %p632_p1 }
  0x2d   : > { %556 = vmatprep.subr.bf16.mxu0 %v622_v15  ;;  %573 = vmatprep.subr.bf16.mxu1 %v622_v15 }
  0x30   : > { %557 = vmatpush3.bf16.msra.mxu0 %v622_v15  ;;  %577 = vmatpush3.bf16.msra.mxu1 %v622_v15 }
  0x33   : > { %559 = vmatmul.mubr.msk.bf16.vlgmr.msra.gmra.mrb[0].mxu0 %vm313_vm0, %v625_v16  ;;  %563 = vmatmul.mubr.msk.bf16.vlgmr.msra.gmra.mrb[0].mxu1 %vm313_vm0, %v626_v17 }
  0x34   : > { %566 = vmatprep.mubr.msk.bf16.mxu1 %vm313_vm0, %v627_v18 }
  0x3b   : > { %567 = vmatmul.mubr.msk.bf16.gmra.mrb[4].mxu1 %vm313_vm0, %v628_v19 }
  0xa1   : > { %v428_v42 = vpop.permute.xlu0 %427 }
 0x106   : > { %v560_v20 = vpop.f32.mrb[0].mxu0  ;;  %v564_v21 = vpop.f32.mrb[0].mxu1 }
 0x107   : > { %v366_v22 = vpop.f32.mrb[1].mxu0  ;;  %v382_v23 = vpop.f32.mrb[1].mxu1 }
 0x108   : > { %v561_v24 = vpop.f32.mrb[2].mxu0  ;;  %v565_v25 = vpop.f32.mrb[2].mxu1 }
 0x109   : > { %v414_v26 = vmax.f32 %v560_v20, %v561_v24  ;;  %v416_v27 = vmax.f32 %v564_v21, %v565_v25  ;;  %v369_v28 = vpop.f32.mrb[3].mxu0  ;;  %v385_v29 = vpop.f32.mrb[3].mxu1 }
 0x10a   : > { %v413_v30 = vmax.f32 %v366_v22, %v369_v28  ;;  %v415_v31 = vmax.f32 %v382_v23, %v385_v29 }
 0x10c   : > { %v419_v32 = vmax.f32 %v413_v30, %v414_v26  ;;  %v420_v33 = vmax.f32 %v415_v31, %v416_v27 }
 0x10e   : > { %v568_v34 = vpop.f32.mrb[4].mxu1  ;;  %v422_v35 = vmax.f32 %v419_v32, %v420_v33 }
 0x10f   : > { %v398_v36 = vpop.f32.mrb[5].mxu1 }
 0x110   : > { %v569_v37 = vpop.f32.mrb[6].mxu1 }
 0x111   : > { %v418_v38 = vmax.f32 %v568_v34, %v569_v37  ;;  %v401_v39 = vpop.f32.mrb[7].mxu1 }
 0x112   : > { %v417_v40 = vmax.f32 %v398_v36, %v401_v39 }
 0x114   : > { %v421_v41 = vmax.f32 %v417_v40, %v418_v38 }
 0x116   : > { %v423_v43 = vmax.f32 %v422_v35, %v421_v41 }
 0x118   : > { %v430_v44 = vadd.f32 %v428_v42, %v423_v43 }
 0x11a   : > { %v431_v45 = vmax.f32 %v430_v44, 0.0 }
 0x11c   : > { %432 = vst [vmem:[%s237_s6] sm:$0xff] %v431_v45 }
 0x11d   : > { %642 = shalt.err (!%p639_p5)
}
 0x11e   : > { %s643_s4 = scalar_lea.hbm %s808_s10, 128  ;;  %s647_s26 = scalar_lea.hbm %s855_s3, 256 }
 0x11f   : > { %p644_p7 = scmp.ne.s32.totalorder %s808_s10, %s643_s4  ;;  %p648_p12 = scmp.lt.u32.totalorder %s808_s10, %s855_s3 }
 0x120   : > { %p649_p13 = scmp.lt.u32.totalorder %s647_s26, %s643_s4  ;;  %p651_p1 = scmp.lt.u32.totalorder %s643_s4, %s808_s10 }
 0x121   : > { %p645_p10 = pnand %p644_p7, %p753_p6 }
 0x122   : > { %p650_p0 = por %p649_p13, %p648_p12 }
 0x123   : > { %p646_p11 = pneg %p645_p10 }
 0x124   : > { %p652_p2 = por %p651_p1, %p650_p0 }
 0x126   : > { %p653_p3 = pnand %p652_p2, %p646_p11 }
 0x128   : > { %656 = shalt.err (!%p653_p3)
}
 0x129   : > { %578 = dma.vmem_to_hbm [thread:$0]  (%p753_p6), %s810_s7, 128, %s808_s10, %s434_s11  }
 0x12a PF: > { %s459_s29 = sand.u32 1, %s679_s12   ;;  %p581_p4 = pnand %p514_p9, %p757_p8 }
 0x12b   : > { %s460_s30 = scalar_lea.sflag [#allocation4], %s459_s29 }
 0x12c   : > { %674 = dma.done.wait (!%p581_p4), %s460_s30, 128  }
 0x12d   : > { %676 = vsyncadd (!%p581_p4), %s460_s30, 4294967168  ;;  %p13_p5 = scmp.ge.s32.totalorder %s738_s18, 4   ;;  %s858_s12 = smov %s683_s13 }
 0x12e   : > { %s859_s13 = smov %s687_s14  ;;  %s860_s14 = smov %s751_s21 }
 0x12f   : > { %s861_s15 = smov %s738_s18  ;;  %15 = sbr.rel (!%p13_p5) target bundleno = 3 (0x3), region = 113 }
 0x136   :  { %465 = vsyncpa [#allocation4], 1 }
 0x137   :  { %467 = vsyncpa [#allocation4 + $0x1], 1 }

</bundles_post_ra>
